<compile_context>
chip_gen: v6e
topology: v6e:2x2x1
jax: 0.10.0
libtpu: 0.0.40
codegen_flags: <defaults>
</compile_context>

<pallas_src>
import jax
import jax.numpy as jnp
from jax.experimental import pallas as pl
from jax.experimental.pallas import tpu as pltpu

IN_PAD = 32     # padded hidden width (>= 30), used for layers 2..4
HIDDEN = 30
OUT_DIM = 3
NUM_LAYERS = 4


def _round_up(n, m):
    return ((n + m - 1) // m) * m


def mlp_kernel(x_ref, w1t_ref, wt_ref, b_ref, out_ref):
    # x_ref:   (d_in, tb)        activations, batch in lanes
    # w1t_ref: (32, d_in)        layer-1 weight, transposed, out-dim padded to 32
    # wt_ref:  (3, 32, 32)       layers 2..4 weights, transposed, zero-padded
    # b_ref:   (4, 32, 1)        biases, zero-padded, broadcast along lanes
    # out_ref: (OUT_DIM, tb)     softmax probabilities, batch in lanes

    # Layer 1: (32, d_in) @ (d_in, tb) -> (32, tb)
    h = jnp.dot(w1t_ref[...], x_ref[...], preferred_element_type=jnp.float32)
    h = jnp.maximum(h + b_ref[0], 0.0)

    # Layers 2, 3: (32, 32) @ (32, tb) -> (32, tb)
    for l in range(2):
        h = jnp.dot(wt_ref[l], h, preferred_element_type=jnp.float32)
        h = jnp.maximum(h + b_ref[l + 1], 0.0)

    # Layer 4 (logits).  Only sublane rows 0..2 are real; padded rows are
    # never read below, so they cannot affect the softmax.
    logits = jnp.dot(wt_ref[2], h, preferred_element_type=jnp.float32) + b_ref[3]

    l0 = logits[0:1, :]
    l1 = logits[1:2, :]
    l2 = logits[2:3, :]

    # Stable softmax over the 3 class rows, all plain VPU ops along lanes.
    m = jnp.maximum(jnp.maximum(l0, l1), l2)
    e0 = jnp.exp(l0 - m)
    e1 = jnp.exp(l1 - m)
    e2 = jnp.exp(l2 - m)
    inv = pl.reciprocal(e0 + e1 + e2, approx=False)  # exact: keeps 1e-5 check

    out_ref[0:1, :] = (e0 * inv).astype(out_ref.dtype)
    out_ref[1:2, :] = (e1 * inv).astype(out_ref.dtype)
    out_ref[2:3, :] = (e2 * inv).astype(out_ref.dtype)


def pack_params(params, input_dim):
    """Pack the 4 (W, b) pairs into transposed, zero-padded slabs."""
    (w1, b1, w2, b2, w3, b3, w4, b4) = params
    # Layer 1 weight kept at native K = input_dim (no feature-pad of x needed).
    w1t = jnp.zeros((IN_PAD, input_dim), jnp.float32)
    w1t = w1t.at[:w1.shape[1], :].set(w1.T)
    # Layers 2..4, transposed, padded to (32, 32).
    WT = jnp.zeros((3, IN_PAD, IN_PAD), jnp.float32)
    for i, w in enumerate((w2, w3, w4)):
        WT = WT.at[i, :w.shape[1], :w.shape[0]].set(w.T)
    # Biases as (layer, feature, 1) so they broadcast along the lane (batch) dim.
    BV = jnp.zeros((NUM_LAYERS, IN_PAD, 1), jnp.float32)
    for i, b in enumerate((b1, b2, b3, b4)):
        BV = BV.at[i, :b.shape[1], 0].set(b[0])
    return w1t, WT, BV


def mlp_forward(x, w1t, wt, bv, *, tile_b=2048):
    """x: (B, d_in) -> (B, OUT_DIM) softmax probabilities."""
    B, d_in = x.shape
    b128 = _round_up(B, 128)
    if b128 >= 256:
        # >= 2 grid steps so the parallel batch axis can use both v7x cores;
        # on v5e/v6e the extra step is ~0.35 us, negligible.
        tb = min(tile_b, _round_up(b128 // 2, 128))
    else:
        tb = b128
    b_pad = _round_up(b128, tb)

    # Batch in lanes: feed x as (d_in, b_pad); only the batch axis is padded.
    x_t = jnp.pad(x.T.astype(jnp.float32), ((0, 0), (0, b_pad - B)))

    out = pl.pallas_call(
        mlp_kernel,
        out_shape=jax.ShapeDtypeStruct((OUT_DIM, b_pad), jnp.float32),
        grid=(b_pad // tb,),
        in_specs=[
            pl.BlockSpec((d_in, tb), lambda i: (0, i)),
            pl.BlockSpec(w1t.shape, lambda i: (0, 0)),        # VMEM-resident
            pl.BlockSpec(wt.shape, lambda i: (0, 0, 0)),      # VMEM-resident
            pl.BlockSpec(bv.shape, lambda i: (0, 0, 0)),      # VMEM-resident
        ],
        out_specs=pl.BlockSpec((OUT_DIM, tb), lambda i: (0, i)),
        compiler_params=pltpu.CompilerParams(
            dimension_semantics=("parallel",)),
    )(x_t, w1t, wt, bv)

    # Wrapper-side transpose back to (B, 3) is tiny layout plumbing.
    return out[:, :B].T


def init_params(key, input_dim):
    dims = [(input_dim, 30), (30, 30), (30, 30), (30, 3)]
    params = []
    for (din, dout) in dims:
        kw, kb, key = jax.random.split(key, 3)
        bound = 1.0 / (din ** 0.5)  # matches nn.Linear default init range
        w = jax.random.uniform(kw, (din, dout), jnp.float32, -bound, bound)
        b = jax.random.uniform(kb, (1, dout), jnp.float32, -bound, bound)
        params += [w, b]
    return params


def reference_forward(x, params):
    (w1, b1, w2, b2, w3, b3, w4, b4) = params
    h = jax.nn.relu(x @ w1 + b1)
    h = jax.nn.relu(h @ w2 + b2)
    h = jax.nn.relu(h @ w3 + b3)
    return jax.nn.softmax(h @ w4 + b4, axis=1)


if __name__ == "__main__":
    key = jax.random.PRNGKey(0)
    kx1, kx2, kp = jax.random.split(key, 3)

    input_dim = 4   # iris features
    params = init_params(kp, input_dim)
    w1t, wt, bv = pack_params(params, input_dim)

    # Small iris-like batch (single grid step).
    x_small = jax.random.normal(kx1, (8, input_dim), jnp.float32)
    out_small = jax.block_until_ready(mlp_forward(x_small, w1t, wt, bv))
    ref_small = reference_forward(x_small, params)
    assert out_small.shape == (8, OUT_DIM)
    assert jnp.allclose(out_small, ref_small, atol=1e-5, rtol=1e-5)
    assert jnp.allclose(jnp.sum(out_small, axis=1), 1.0, atol=1e-5)

    # Larger, non-multiple batch (exercises the 2-step parallel grid + padding).
    x_big = jax.random.normal(kx2, (1000, input_dim), jnp.float32)
    out_big = jax.block_until_ready(mlp_forward(x_big, w1t, wt, bv))
    ref_big = reference_forward(x_big, params)
    assert out_big.shape == (1000, OUT_DIM)
    assert jnp.allclose(out_big, ref_big, atol=1e-5, rtol=1e-5)
    assert jnp.allclose(jnp.sum(out_big, axis=1), 1.0, atol=1e-5)

    print("KERNEL_OK")
</pallas_src>

<mosaic_0001>
module attributes {stable_mosaic.version = 11 : i64} {
  func.func @mlp_kernel(%arg0: i32, %arg1: memref<4x128xf32, #tpu.memory_space<vmem>>, %arg2: memref<32x4xf32, #tpu.memory_space<vmem>>, %arg3: memref<3x32x32xf32, #tpu.memory_space<vmem>>, %arg4: memref<4x32x1xf32, #tpu.memory_space<vmem>>, %arg5: memref<3x128xf32, #tpu.memory_space<vmem>>) attributes {dimension_semantics = [#tpu.dimension_semantics<parallel>], iteration_bounds = array<i64: 1>, scalar_prefetch = 0 : i64, scratch_operands = 0 : i64, tpu.core_type = #tpu.core_type<tc>, window_params = [{transform_indices = @transform_0, window_bounds = array<i64: 4, 128>}, {pipeline_mode = #tpu.pipeline_mode<synchronous>, transform_indices = @transform_1, window_bounds = array<i64: 32, 4>}, {pipeline_mode = #tpu.pipeline_mode<synchronous>, transform_indices = @transform_2, window_bounds = array<i64: 3, 32, 32>}, {pipeline_mode = #tpu.pipeline_mode<synchronous>, transform_indices = @transform_3, window_bounds = array<i64: 4, 32, 1>}, {transform_indices = @transform_4, window_bounds = array<i64: 3, 128>}]} {
    %c0 = arith.constant 0 : index
    %c0_0 = arith.constant 0 : index
    %0 = vector.load %arg2[%c0, %c0_0] : memref<32x4xf32, #tpu.memory_space<vmem>>, vector<32x4xf32>
    %c0_1 = arith.constant 0 : index
    %c0_2 = arith.constant 0 : index
    %1 = vector.load %arg1[%c0_1, %c0_2] : memref<4x128xf32, #tpu.memory_space<vmem>>, vector<4x128xf32>
    %cst = arith.constant dense<0.000000e+00> : vector<32x128xf32>
    %2 = tpu.matmul %0, %1, %cst {dimension_numbers = #tpu.dot_dimension_numbers<[1], [0], [0], [1], [0, 0, 1, 1], [], []>} : vector<32x4xf32>, vector<4x128xf32>, vector<32x128xf32> -> vector<32x128xf32>
    %c0_3 = arith.constant 0 : index
    %c0_4 = arith.constant 0 : index
    %c0_5 = arith.constant 0 : index
    %3 = vector.load %arg4[%c0_3, %c0_4, %c0_5] : memref<4x32x1xf32, #tpu.memory_space<vmem>>, vector<1x32x1xf32>
    %4 = vector.shape_cast %3 : vector<1x32x1xf32> to vector<32x1xf32>
    %5 = vector.broadcast %4 : vector<32x1xf32> to vector<32x128xf32>
    %6 = arith.addf %2, %5 : vector<32x128xf32>
    %cst_6 = arith.constant 0.000000e+00 : f32
    %7 = vector.broadcast %cst_6 : f32 to vector<32x128xf32>
    %8 = arith.maximumf %6, %7 : vector<32x128xf32>
    %c0_7 = arith.constant 0 : index
    %c0_8 = arith.constant 0 : index
    %c0_9 = arith.constant 0 : index
    %9 = vector.load %arg3[%c0_7, %c0_8, %c0_9] : memref<3x32x32xf32, #tpu.memory_space<vmem>>, vector<1x32x32xf32>
    %10 = vector.shape_cast %9 : vector<1x32x32xf32> to vector<32x32xf32>
    %cst_10 = arith.constant dense<0.000000e+00> : vector<32x128xf32>
    %11 = tpu.matmul %10, %8, %cst_10 {dimension_numbers = #tpu.dot_dimension_numbers<[1], [0], [0], [1], [0, 0, 1, 1], [], []>} : vector<32x32xf32>, vector<32x128xf32>, vector<32x128xf32> -> vector<32x128xf32>
    %c1 = arith.constant 1 : index
    %c0_11 = arith.constant 0 : index
    %c0_12 = arith.constant 0 : index
    %12 = vector.load %arg4[%c1, %c0_11, %c0_12] : memref<4x32x1xf32, #tpu.memory_space<vmem>>, vector<1x32x1xf32>
    %13 = vector.shape_cast %12 : vector<1x32x1xf32> to vector<32x1xf32>
    %14 = vector.broadcast %13 : vector<32x1xf32> to vector<32x128xf32>
    %15 = arith.addf %11, %14 : vector<32x128xf32>
    %cst_13 = arith.constant 0.000000e+00 : f32
    %16 = vector.broadcast %cst_13 : f32 to vector<32x128xf32>
    %17 = arith.maximumf %15, %16 : vector<32x128xf32>
    %c1_14 = arith.constant 1 : index
    %c0_15 = arith.constant 0 : index
    %c0_16 = arith.constant 0 : index
    %18 = vector.load %arg3[%c1_14, %c0_15, %c0_16] : memref<3x32x32xf32, #tpu.memory_space<vmem>>, vector<1x32x32xf32>
    %19 = vector.shape_cast %18 : vector<1x32x32xf32> to vector<32x32xf32>
    %cst_17 = arith.constant dense<0.000000e+00> : vector<32x128xf32>
    %20 = tpu.matmul %19, %17, %cst_17 {dimension_numbers = #tpu.dot_dimension_numbers<[1], [0], [0], [1], [0, 0, 1, 1], [], []>} : vector<32x32xf32>, vector<32x128xf32>, vector<32x128xf32> -> vector<32x128xf32>
    %c2 = arith.constant 2 : index
    %c0_18 = arith.constant 0 : index
    %c0_19 = arith.constant 0 : index
    %21 = vector.load %arg4[%c2, %c0_18, %c0_19] : memref<4x32x1xf32, #tpu.memory_space<vmem>>, vector<1x32x1xf32>
    %22 = vector.shape_cast %21 : vector<1x32x1xf32> to vector<32x1xf32>
    %23 = vector.broadcast %22 : vector<32x1xf32> to vector<32x128xf32>
    %24 = arith.addf %20, %23 : vector<32x128xf32>
    %cst_20 = arith.constant 0.000000e+00 : f32
    %25 = vector.broadcast %cst_20 : f32 to vector<32x128xf32>
    %26 = arith.maximumf %24, %25 : vector<32x128xf32>
    %c2_21 = arith.constant 2 : index
    %c0_22 = arith.constant 0 : index
    %c0_23 = arith.constant 0 : index
    %27 = vector.load %arg3[%c2_21, %c0_22, %c0_23] : memref<3x32x32xf32, #tpu.memory_space<vmem>>, vector<1x32x32xf32>
    %28 = vector.shape_cast %27 : vector<1x32x32xf32> to vector<32x32xf32>
    %cst_24 = arith.constant dense<0.000000e+00> : vector<32x128xf32>
    %29 = tpu.matmul %28, %26, %cst_24 {dimension_numbers = #tpu.dot_dimension_numbers<[1], [0], [0], [1], [0, 0, 1, 1], [], []>} : vector<32x32xf32>, vector<32x128xf32>, vector<32x128xf32> -> vector<32x128xf32>
    %c3 = arith.constant 3 : index
    %c0_25 = arith.constant 0 : index
    %c0_26 = arith.constant 0 : index
    %30 = vector.load %arg4[%c3, %c0_25, %c0_26] : memref<4x32x1xf32, #tpu.memory_space<vmem>>, vector<1x32x1xf32>
    %31 = vector.shape_cast %30 : vector<1x32x1xf32> to vector<32x1xf32>
    %32 = vector.broadcast %31 : vector<32x1xf32> to vector<32x128xf32>
    %33 = arith.addf %29, %32 : vector<32x128xf32>
    %34 = vector.extract_strided_slice %33 {offsets = [0, 0], sizes = [1, 128], strides = [1, 1]} : vector<32x128xf32> to vector<1x128xf32>
    %35 = vector.extract_strided_slice %33 {offsets = [1, 0], sizes = [1, 128], strides = [1, 1]} : vector<32x128xf32> to vector<1x128xf32>
    %36 = vector.extract_strided_slice %33 {offsets = [2, 0], sizes = [1, 128], strides = [1, 1]} : vector<32x128xf32> to vector<1x128xf32>
    %37 = arith.maximumf %34, %35 : vector<1x128xf32>
    %38 = arith.maximumf %37, %36 : vector<1x128xf32>
    %39 = arith.subf %34, %38 : vector<1x128xf32>
    %40 = math.exp %39 : vector<1x128xf32>
    %41 = arith.subf %35, %38 : vector<1x128xf32>
    %42 = math.exp %41 : vector<1x128xf32>
    %43 = arith.subf %36, %38 : vector<1x128xf32>
    %44 = math.exp %43 : vector<1x128xf32>
    %45 = arith.addf %40, %42 : vector<1x128xf32>
    %46 = arith.addf %45, %44 : vector<1x128xf32>
    %47 = tpu.reciprocal %46 : vector<1x128xf32> -> vector<1x128xf32>
    %48 = arith.mulf %40, %47 : vector<1x128xf32>
    %c0_27 = arith.constant 0 : index
    %c0_28 = arith.constant 0 : index
    %49 = vector.load %arg5[%c0_27, %c0_28] : memref<3x128xf32, #tpu.memory_space<vmem>>, vector<1x128xf32>
    tpu.vector_store %arg5[%c0_27, %c0_28], %48 {strides = array<i32>} : memref<3x128xf32, #tpu.memory_space<vmem>>, vector<1x128xf32>,
    %50 = arith.mulf %42, %47 : vector<1x128xf32>
    %c1_29 = arith.constant 1 : index
    %c0_30 = arith.constant 0 : index
    %51 = vector.load %arg5[%c1_29, %c0_30] : memref<3x128xf32, #tpu.memory_space<vmem>>, vector<1x128xf32>
    tpu.vector_store %arg5[%c1_29, %c0_30], %50 {strides = array<i32>} : memref<3x128xf32, #tpu.memory_space<vmem>>, vector<1x128xf32>,
    %52 = arith.mulf %44, %47 : vector<1x128xf32>
    %c2_31 = arith.constant 2 : index
    %c0_32 = arith.constant 0 : index
    %53 = vector.load %arg5[%c2_31, %c0_32] : memref<3x128xf32, #tpu.memory_space<vmem>>, vector<1x128xf32>
    tpu.vector_store %arg5[%c2_31, %c0_32], %52 {strides = array<i32>} : memref<3x128xf32, #tpu.memory_space<vmem>>, vector<1x128xf32>,
    return
  }
  func.func @transform_0(%arg0: i32) -> (i32, i32) {
    %c0_i32 = arith.constant 0 : i32
    %c0_i32_0 = arith.constant 0 : i32
    return %c0_i32, %arg0 : i32, i32
  }
  func.func @transform_1(%arg0: i32) -> (i32, i32) {
    %c0_i32 = arith.constant 0 : i32
    %c0_i32_0 = arith.constant 0 : i32
    %c0_i32_1 = arith.constant 0 : i32
    return %c0_i32, %c0_i32_0 : i32, i32
  }
  func.func @transform_2(%arg0: i32) -> (i32, i32, i32) {
    %c0_i32 = arith.constant 0 : i32
    %c0_i32_0 = arith.constant 0 : i32
    %c0_i32_1 = arith.constant 0 : i32
    %c0_i32_2 = arith.constant 0 : i32
    return %c0_i32, %c0_i32_0, %c0_i32_1 : i32, i32, i32
  }
  func.func @transform_3(%arg0: i32) -> (i32, i32, i32) {
    %c0_i32 = arith.constant 0 : i32
    %c0_i32_0 = arith.constant 0 : i32
    %c0_i32_1 = arith.constant 0 : i32
    %c0_i32_2 = arith.constant 0 : i32
    return %c0_i32, %c0_i32_0, %c0_i32_1 : i32, i32, i32
  }
  func.func @transform_4(%arg0: i32) -> (i32, i32) {
    %c0_i32 = arith.constant 0 : i32
    %c0_i32_0 = arith.constant 0 : i32
    return %c0_i32, %arg0 : i32, i32
  }
}

</mosaic_0001>

<bundles_post_ra>
// kernel: tpu_custom_call.1
= control target key start
LH: loop header
LB: loop body
LE: loop exit
PB: predicated region body
PF: predicated region fallthrough
CT: control target
= control target key end

     0   :  { %vm60_vm0 = vcmask 1043456   ;;  %vm47_vm1 = vcmask 31744   ;;  %v749_v5 = vmov 0   ;;  %s885_s0 = inlined_call_operand.vmem [shape: f32[4,128], index: 0, kind: input, shape index: {}]   ;;  %s886_s1 = inlined_call_operand.vmem [shape: f32[32,4], index: 1, kind: input, shape index: {}]   ;;  %s887_s2 = inlined_call_operand.vmem [shape: f32[3,32,32], index: 2, kind: input, shape index: {}]   ;;  %s888_s3 = inlined_call_operand.vmem [shape: f32[4,32,1], index: 3, kind: input, shape index: {}]   ;;  %s889_s4 = inlined_call_operand.hbm [shape: f32[3,128], index: 4, kind: output, shape index: {}]  }
   0x1   :  { %v22_v0 = vld [vmem:[%s885_s0] sm:$0xf]  ;;  %v19_v2 = vld [vmem:[%s886_s1 + $0x8] sm:$0xff]  ;;  %v20_v3 = vld [vmem:[%s886_s1 + $0x10] sm:$0xff]  ;;  %717 = vset.pattern.permute.xlu0 %v749_v5  ;;  %718 = vset.pattern.permute.xlu1 %v749_v5 }
   0x2   :  { %v18_v1 = vld [vmem:[%s886_s1] sm:$0xff]  ;;  %657 = vmatprep.subr.msk.mxu0 %vm60_vm0, %v22_v0  ;;  %v26_v4 = vld [vmem:[%s888_s3 + $0x18] sm:$0xff]  ;;  %v24_v6 = vld [vmem:[%s888_s3 + $0x8] sm:$0xff] }
   0x3   :  { %659 = vmatprep.mubr.msk.f32.mxu0 %vm47_vm1, %v18_v1  ;;  %658 = vmatpush3.msk.msra.mxu0 %vm60_vm0, %v22_v0  ;;  %v21_v7 = vld [vmem:[%s886_s1 + $0x18] sm:$0xff]  ;;  %v25_v8 = vld [vmem:[%s888_s3 + $0x10] sm:$0xff]  ;;  %v23_v9 = vld [vmem:[%s888_s3] sm:$0xff] }
   0x4   :  { %660 = vmatmul.mubr.msk.f32.vlgmr.msra.gmra.mxu0 %vm47_vm1, %v19_v2  ;;  %44 = vperm.xlu0 %717, %v26_v4  }
   0x5   :  { %662 = vmatprep.mubr.msk.f32.mxu0 %vm47_vm1, %v20_v3  ;;  %34 = vperm.xlu1 %718, %v24_v6  }
   0x6   :  { %9 = vsyncpa [#allocation3], 0  ;;  %v599_v10 = vld [vmem:[%s888_s3 + $0x38] sm:$0xff]  ;;  %v598_v11 = vld [vmem:[%s888_s3 + $0x30] sm:$0xff]  ;;  %vm182_vm2 = vcmask 261120  }
   0x7   :  { %v597_v12 = vld [vmem:[%s888_s3 + $0x28] sm:$0xff]  ;;  %v596_v13 = vld [vmem:[%s888_s3 + $0x20] sm:$0xff]  ;;  %v611_v14 = vld [vmem:[%s888_s3 + $0x58] sm:$0xff] }
   0x8   :  { %663 = vmatmul.mubr.msk.f32.gmra.mxu0 %vm47_vm1, %v21_v7  ;;  %39 = vperm.xlu0 %717, %v25_v8   ;;  %v610_v15 = vld [vmem:[%s888_s3 + $0x50] sm:$0xff]  ;;  %v609_v16 = vld [vmem:[%s888_s3 + $0x48] sm:$0xff]  ;;  %v608_v17 = vld [vmem:[%s888_s3 + $0x40] sm:$0xff] }
   0x9   :  { %29 = vperm.xlu1 %718, %v23_v9   ;;  %v620_v18 = vld [vmem:[%s888_s3 + $0x60] sm:$0xff]  ;;  %v154_v36 = vld [vmem:[%s887_s2 + $0x8] sm:$0xff]  ;;  %v155_v37 = vld [vmem:[%s887_s2 + $0x10] sm:$0xff] }
   0xa   :  { %v153_v19 = vld [vmem:[%s887_s2] sm:$0xff]  ;;  %v156_v38 = vld [vmem:[%s887_s2 + $0x18] sm:$0xff]  ;;  %v605_v56 = vld [vmem:[%s887_s2 + $0x28] sm:$0xff] }
   0xb   :  { %673 = vmatprep.mubr.msk.f32.mxu1 %vm182_vm2, %v153_v19  ;;  %v604_v39 = vld [vmem:[%s887_s2 + $0x20] sm:$0xff]  ;;  %v606_v57 = vld [vmem:[%s887_s2 + $0x30] sm:$0xff]  ;;  %v607_v58 = vld [vmem:[%s887_s2 + $0x38] sm:$0xff] }
   0xc   :  { %179 = vperm.xlu0 %717, %v599_v10   ;;  %687 = vmatprep.mubr.msk.f32.mxu0 %vm182_vm2, %v604_v39  ;;  %v616_v59 = vld [vmem:[%s887_s2 + $0x40] sm:$0xff]  ;;  %v618_v60 = vld [vmem:[%s887_s2 + $0x50] sm:$0xff] }
   0xd   :  { %174 = vperm.xlu1 %718, %v598_v11  }
  0x10   :  { %169 = vperm.xlu0 %717, %v597_v12  }
  0x11   :  { %164 = vperm.xlu1 %718, %v596_v13   ;;  %v617_v13 = vld [vmem:[%s887_s2 + $0x48] sm:$0xff] }
  0x14   :  { %311 = vperm.xlu0 %717, %v611_v14   ;;  %v619_v14 = vld [vmem:[%s887_s2 + $0x58] sm:$0xff]  ;;  %s750_s2 = smov [#allocation2]  }
  0x15   :  { %306 = vperm.xlu1 %718, %v610_v15   ;;  %s583_s18 = sshll.u32 %s750_s2, 4  ;;  %s584_s18 = int_to_ptr.vmem [resolvable:$true] %s583_s18 }
  0x16   :  { %s727_s19 = scalar_lea.vmem %s584_s18, 64  ;;  %p732_p1 = scmp.lt.s32.totalorder %s584_s18, %s584_s18 }
  0x17   :  { %p728_p0 = scmp.ne.s32.totalorder %s584_s18, %s727_s19  ;;  %p733_p2 = scmp.lt.s32.totalorder %s727_s19, %s727_s19 }
  0x18   :  { %301 = vperm.xlu0 %717, %v609_v16  }
  0x19   :  { %296 = vperm.xlu1 %718, %v608_v17   ;;  %p734_p3 = por %p733_p2, %p732_p1 }
  0x1b   :  { %p735_p4 = pnand %p734_p3, %p728_p0 }
  0x1c   :  { %427 = vperm.xlu0 %717, %v620_v18  }
  0x7f   :  { %v45_v20 = vpop.permute.xlu0 %44 }
  0x80   :  { %v35_v22 = vpop.permute.xlu1 %34 }
  0x83   :  { %v40_v26 = vpop.permute.xlu0 %39 }
  0x84   :  { %v30_v31 = vpop.permute.xlu1 %29 }
  0x87   :  { %v180_v40 = vpop.permute.xlu0 %179 }
  0x88   :  { %v175_v42 = vpop.permute.xlu1 %174 }
  0x8b   :  { %v170_v46 = vpop.permute.xlu0 %169 }
  0x8c   :  { %v165_v51 = vpop.permute.xlu1 %164 }
  0x8f   :  { %v312_v61 = vpop.permute.xlu0 %311 }
  0x90   :  { %v307_v63 = vpop.permute.xlu1 %306 }
  0x93   :  { %v302_v3 = vpop.permute.xlu0 %301 }
  0x94   :  { %v297_v8 = vpop.permute.xlu1 %296 }
  0x97   :  { %v428_v17 = vpop.permute.xlu0 %427 }
  0xc4   :  { %v661_v21 = vpop.f32.mrf.mxu0 }
  0xc5   :  { %v136_v28 = vadd.f32 %v661_v21, %v35_v22 }
  0xc6   :  { %v130_v23 = vpop.f32.mrf.mxu0 }
  0xc7   :  { %v131_v32 = vadd.f32 %v130_v23, %v30_v31  ;;  %v150_v34 = vmax.f32 %v136_v28, 0.0 }
  0xc8   :  { %v664_v24 = vpop.f32.mrf.mxu0 }
  0xc9   :  { %v146_v25 = vadd.f32 %v664_v24, %v45_v20  ;;  %v149_v35 = vmax.f32 %v131_v32, 0.0 }
  0xca   :  { %v140_v27 = vpop.f32.mrf.mxu0 }
  0xcb   :  { %v152_v29 = vmax.f32 %v146_v25, 0.0  ;;  %v141_v30 = vadd.f32 %v140_v27, %v40_v26 }
  0xcd   :  { %v151_v33 = vmax.f32 %v141_v30, 0.0  ;;  %665 = vmatprep.subr.mxu1 %v152_v29 }
  0xce   :  { %666 = vmatpush3.msra.mxu1 %v152_v29 }
  0xcf   :  { %667 = vmatprep.subr.mxu1 %v151_v33 }
  0xd0   :  { %668 = vmatpush3.msra.mxu1 %v151_v33 }
  0xd1   :  { %669 = vmatprep.subr.mxu1 %v150_v34 }
  0xd2   :  { %670 = vmatpush3.msra.mxu1 %v150_v34 }
  0xd3   :  { %671 = vmatprep.subr.mxu1 %v149_v35 }
  0xd4   :  { %672 = vmatpush3.msra.mxu1 %v149_v35 }
  0xd5   :  { %674 = vmatmul.mubr.msk.f32.vlgmr.msra.gmra.mxu1 %vm182_vm2, %v154_v36 }
  0xd6   :  { %676 = vmatprep.mubr.msk.f32.mxu1 %vm182_vm2, %v155_v37 }
  0xd9   :  { %677 = vmatmul.mubr.msk.f32.gmra.mxu1 %vm182_vm2, %v156_v38 }
  0xda   :  { %704 = vmatprep.mubr.msk.f32.mxu1 %vm182_vm2, %v618_v60 }
 0x195   :  { %v675_v41 = vpop.f32.mrf.mxu1 }
 0x196   :  { %v267_v48 = vadd.f32 %v675_v41, %v170_v46 }
 0x197   :  { %v261_v43 = vpop.f32.mrf.mxu1 }
 0x198   :  { %v262_v52 = vadd.f32 %v261_v43, %v165_v51  ;;  %v281_v54 = vmax.f32 %v267_v48, 0.0 }
 0x199   :  { %v678_v44 = vpop.f32.mrf.mxu1 }
 0x19a   :  { %v277_v45 = vadd.f32 %v678_v44, %v180_v40  ;;  %v280_v55 = vmax.f32 %v262_v52, 0.0 }
 0x19b   :  { %v271_v47 = vpop.f32.mrf.mxu1 }
 0x19c   :  { %v283_v49 = vmax.f32 %v277_v45, 0.0  ;;  %v272_v50 = vadd.f32 %v271_v47, %v175_v42 }
 0x19e   :  { %v282_v53 = vmax.f32 %v272_v50, 0.0  ;;  %679 = vmatprep.subr.mxu0 %v283_v49 }
 0x19f   :  { %680 = vmatpush3.msra.mxu0 %v283_v49 }
 0x1a0   :  { %681 = vmatprep.subr.mxu0 %v282_v53 }
 0x1a1   :  { %682 = vmatpush3.msra.mxu0 %v282_v53 }
 0x1a2   :  { %683 = vmatprep.subr.mxu0 %v281_v54 }
 0x1a3   :  { %684 = vmatpush3.msra.mxu0 %v281_v54 }
 0x1a4   :  { %685 = vmatprep.subr.mxu0 %v280_v55 }
 0x1a5   :  { %686 = vmatpush3.msra.mxu0 %v280_v55 }
 0x1a6   :  { %688 = vmatmul.mubr.msk.f32.vlgmr.msra.gmra.mxu0 %vm182_vm2, %v605_v56 }
 0x1a7   :  { %690 = vmatprep.mubr.msk.f32.mxu0 %vm182_vm2, %v606_v57 }
 0x1aa   :  { %691 = vmatmul.mubr.msk.f32.gmra.mxu0 %vm182_vm2, %v607_v58 }
 0x1ab   :  { %701 = vmatprep.mubr.msk.f32.mxu0 %vm182_vm2, %v616_v59 }
 0x266   :  { %v689_v62 = vpop.f32.mrf.mxu0 }
 0x267   :  { %v398_v5 = vadd.f32 %v689_v62, %v302_v3 }
 0x268   :  { %v392_v0 = vpop.f32.mrf.mxu0 }
 0x269   :  { %v393_v9 = vadd.f32 %v392_v0, %v297_v8  ;;  %v412_v11 = vmax.f32 %v398_v5, 0.0 }
 0x26a   :  { %v692_v1 = vpop.f32.mrf.mxu0 }
 0x26b   :  { %v408_v2 = vadd.f32 %v692_v1, %v312_v61  ;;  %v411_v12 = vmax.f32 %v393_v9, 0.0 }
 0x26c   :  { %v402_v4 = vpop.f32.mrf.mxu0 }
 0x26d   :  { %v414_v6 = vmax.f32 %v408_v2, 0.0  ;;  %v403_v7 = vadd.f32 %v402_v4, %v307_v63 }
 0x26f   :  { %v413_v10 = vmax.f32 %v403_v7, 0.0  ;;  %693 = vmatprep.subr.mxu0 %v414_v6  ;;  %707 = vmatprep.subr.mxu1 %v414_v6 }
 0x270   :  { %694 = vmatpush3.msra.mxu0 %v414_v6  ;;  %711 = vmatpush3.msra.mxu1 %v414_v6 }
 0x271   :  { %695 = vmatprep.subr.mxu0 %v413_v10  ;;  %708 = vmatprep.subr.mxu1 %v413_v10 }
 0x272   :  { %696 = vmatpush3.msra.mxu0 %v413_v10  ;;  %712 = vmatpush3.msra.mxu1 %v413_v10 }
 0x273   :  { %697 = vmatprep.subr.mxu0 %v412_v11  ;;  %709 = vmatprep.subr.mxu1 %v412_v11 }
 0x274   :  { %698 = vmatpush3.msra.mxu0 %v412_v11  ;;  %713 = vmatpush3.msra.mxu1 %v412_v11 }
 0x275   :  { %699 = vmatprep.subr.mxu0 %v411_v12  ;;  %710 = vmatprep.subr.mxu1 %v411_v12 }
 0x276   :  { %700 = vmatpush3.msra.mxu0 %v411_v12  ;;  %714 = vmatpush3.msra.mxu1 %v411_v12 }
 0x277   :  { %702 = vmatmul.mubr.msk.f32.vlgmr.msra.gmra.mxu0 %vm182_vm2, %v617_v13  ;;  %705 = vmatmul.mubr.msk.f32.vlgmr.msra.gmra.mxu1 %vm182_vm2, %v619_v14 }
 0x337   :  { %v703_v15 = vpop.f32.mrf.mxu0  ;;  %v706_v16 = vpop.f32.mrf.mxu1 }
 0x339   :  { %v520_v18 = vpop.f32.mrf.mxu0  ;;  %v529_v19 = vpop.f32.mrf.mxu1 }
 0x33a   :  { %v521_v20 = vadd.f32 %v520_v18, %v428_v17 }
 0x33c   :  { %v537_v21 = vrot.slane %v521_v20, 1  ;;  %v540_v23 = vrot.slane %v521_v20, 2 }
 0x33e   :  { %v539_v22 = vmax.f32 %v521_v20, %v537_v21 }
 0x340   :  { %v542_v24 = vmax.f32 %v539_v22, %v540_v23 }
 0x342   :  { %v543_v25 = vsub.f32 %v521_v20, %v542_v24  ;;  %v547_v26 = vrot.slane %v542_v24, 7  ;;  %v552_v27 = vrot.slane %v542_v24, 6 }
 0x344   :  { %v549_v28 = vsub.f32 %v521_v20, %v547_v26  ;;  %v554_v29 = vsub.f32 %v521_v20, %v552_v27  ;;  %v544_v30 = vmul.f32 1.442695, %v543_v25 }
 0x346   :  { %v550_v31 = vmul.f32 1.442695, %v549_v28  ;;  %v555_v32 = vmul.f32 1.442695, %v554_v29 }
 0x348   :  { %719 = vpow2.f32 %v550_v31 }
 0x349   :  { %721 = vpow2.f32 %v555_v32 }
 0x34a   :  { %723 = vpow2.f32 %v544_v30 }
 0x355   :  { %v720_v33 = vpop.eup %719 }
 0x356   :  { %v722_v34 = vpop.eup %721  ;;  %v558_v35 = vrot.slane %v720_v33, 1 }
 0x357   :  { %v724_v36 = vpop.eup %723  ;;  %v562_v38 = vrot.slane %v722_v34, 2 }
 0x358   :  { %v560_v37 = vadd.f32 %v724_v36, %v558_v35 }
 0x35a   :  { %v564_v39 = vadd.f32 %v562_v38, %v560_v37 }
 0x35c   :  { %725 = vrcp.f32 %v564_v39 }
 0x369   :  { %v726_v40 = vpop.eup %725 }
 0x36a   :  { %v566_v41 = vmul.f32 %v726_v40, %v724_v36  ;;  %v569_v42 = vrot.slane %v726_v40, 7  ;;  %v573_v43 = vrot.slane %v726_v40, 6 }
 0x36c   :  { %567 = vst [vmem:[#allocation2] sm:$0x1] %v566_v41  ;;  %v571_v44 = vmul.f32 %v720_v33, %v569_v42  ;;  %v575_v45 = vmul.f32 %v722_v34, %v573_v43 }
 0x36e   :  { %572 = vst [vmem:[#allocation2] sm:$0x2] %v571_v44  ;;  %576 = vst [vmem:[#allocation2] sm:$0x4] %v575_v45 }
 0x36f   :  { %738 = shalt.err (!%p735_p4)
}
 0x370   :  { %586 = dma.vmem_to_hbm [thread:$0]  %s584_s18, 64, %s889_s4, [#allocation3]  }
 0x371   :  { %747 = dma.done.wait [#allocation3], 64  }
 0x372   :  { %748 = vsyncadd [#allocation3], 4294967232 }
 0x373   :  { %590 = vsyncpa [#allocation3], 1 }

</bundles_post_ra>
